<compile_context>
chip_gen: v6e
topology: v6e:2x2x1
jax: 0.10.0
libtpu: 0.0.40
codegen_flags: <defaults>
</compile_context>

<pallas_src>
import math

import jax
import jax.numpy as jnp
from jax.experimental import pallas as pl
from jax.experimental.pallas import tpu as pltpu


def _vmem_plan():
    """Generation-aware (scoped-VMEM limit, per-step block budget) in bytes."""
    try:
        cap = int(pltpu.get_tpu_info().vmem_capacity_bytes)
    except Exception:  # no TPU info available -> conservative (v7x-sized) plan
        cap = 64 * 1024 * 1024
    if cap >= 96 * 1024 * 1024:          # v5e / v6e: 128 MiB physical VMEM
        return 80 * 1024 * 1024, 40 * 1024 * 1024
    # v7x: 64 MiB per TensorCore (2 cores/chip) -> stay well inside it
    return 48 * 1024 * 1024, 24 * 1024 * 1024


def _choose_batch_block(B, T, E, H, itemsize, budget_bytes, limit_bytes,
                        min_grid_steps=8):
    """Batch rows per grid step from a VMEM budget, keeping the grid deep."""
    # Double-buffered per-row traffic: ht input block + attn/ct output blocks.
    per_row = 2 * T * E * itemsize + 2 * (T * H + E) * itemsize
    # Per-step fixed cost: query/sel blocks (double-buffered) + per-row f32
    # temporaries (p_rep & weighted (T, E), scores/exp/p (T, H)).
    fixed = 2 * (E * H) * itemsize + 2 * (H * E) * 4
    fixed += (2 * T * E + 4 * T * H) * 4
    if per_row + fixed > limit_bytes:
        # TODO(synk): online-softmax T grid axis would remove this restriction.
        raise ValueError(
            f"A single (1, T={T}, E={E}) row needs ~{per_row + fixed} bytes of "
            f"VMEM which exceeds the {limit_bytes}-byte scoped limit for this "
            "TPU generation; a T-blocked online-softmax variant is required.")
    bblk = max(1, (budget_bytes - fixed) // per_row)
    bblk = min(bblk, B)
    # Keep >= ~min_grid_steps grid steps when B allows so DMA in / compute /
    # writeback pipeline and the 'parallel' axis can shard across TensorCores.
    bblk = min(bblk, max(1, pl.cdiv(B, min_grid_steps)))
    return max(1, int(bblk))


def _make_kernel(bblk, scale, with_attn):
    """Kernel factory: processes one (bblk, T, E) batch block per grid step."""

    def kernel(ht_ref, wq_ref, sel_ref, ct_ref, *maybe_attn):
        # ht_ref:  (bblk, T, E) input slab (E = H * D, head-major channels)
        # wq_ref:  (E, H) block-diagonal query embedding (stationary weights)
        # sel_ref: (H, E) f32 one-hot head->channel broadcast matrix
        # ct_ref:  (bblk, 1, E) pooled context vectors
        # attn:    (bblk, T, H) attention (module's native layout), optional
        attn_ref = maybe_attn[0] if with_attn else None
        wq = wq_ref[...]      # loaded once per grid step (stationary weights)
        sel = sel_ref[...]    # (H, E) f32

        def row(b, carry):
            ht_b = ht_ref[b]                                     # (T, E)
            # scores[t, h] = <ht_b[t], wq[:, h]> * 1/sqrt(d_k); MXU with the
            # small (E, H) operand stationary, M = T streaming rows, f32 acc.
            s = jnp.dot(ht_b, wq, preferred_element_type=jnp.float32) * scale
            # Softmax over the sequence axis (torch dim=-2), all in f32.
            m = jnp.max(s, axis=0, keepdims=True)                # (1, H)
            e = jnp.exp(s - m)                                   # (T, H)
            den = jnp.sum(e, axis=0, keepdims=True)              # (1, H)
            inv = pl.reciprocal(den, approx=True)                # EUP slot
            inv = inv * (2.0 - den * inv)                        # Newton step
            p = e * inv                                          # (T, H) f32
            if with_attn:
                attn_ref[b] = p.astype(attn_ref.dtype)
            # Pooling: broadcast p along lanes to (T, E) with the one-hot sel
            # matrix (tiny K=H matmul), then a full-lane VPU multiply with ht
            # and a sublane reduce over T.  No ct_heads temporary, no sum over
            # heads, ht never stationary.
            p_rep = jnp.dot(p, sel, preferred_element_type=jnp.float32)  # (T,E)
            weighted = p_rep * ht_b.astype(jnp.float32)
            ct_ref[b] = jnp.sum(
                weighted, axis=0, keepdims=True).astype(ct_ref.dtype)    # (1,E)
            return carry

        jax.lax.fori_loop(0, bblk, row, 0)

    return kernel


def make_pooling_params(query, heads_number, head_size, param_dtype=jnp.float32):
    """Hoisted, once-per-weight-update construction of the kernel constants.

    Returns:
      wq:  (E, H) block-diagonal embedding of query (unscaled; 1/sqrt(d_k) is
           applied inside the kernel so input rounding matches the reference).
      sel: (H, E) f32 one-hot matrix, sel[h, h*D + d] = 1.
    """
    D, H = query.shape
    assert (D, H) == (head_size, heads_number)
    E = D * H
    eye = jnp.eye(H, dtype=jnp.float32)
    # wq3[h, d, h'] = (h == h') * query[d, h]  -> flatten (h, d) head-major.
    wq3 = query.astype(jnp.float32).T[:, :, None] * eye[:, None, :]
    wq = wq3.reshape(E, H).astype(param_dtype)
    sel = jnp.repeat(eye, D, axis=1)                              # (H, E)
    return wq, sel


def multi_head_attention_forward(ht, wq, sel, *, batch_block=None,
                                 return_alignment=True):
    """Returns (context_vectors (B, E), alignment (B, T, H)) — or only the
    context vectors when return_alignment=False (skips the attention output
    and its HBM writeback entirely)."""
    B, T, E = ht.shape
    E2, H = wq.shape
    assert E2 == E and sel.shape == (H, E) and E % H == 0
    d_k = H                      # faithful: torch's query.size(-1) == heads
    scale = 1.0 / math.sqrt(d_k)

    limit_bytes, budget_bytes = _vmem_plan()
    itemsize = jnp.dtype(ht.dtype).itemsize
    if batch_block is None:
        bblk = _choose_batch_block(B, T, E, H, itemsize,
                                   budget_bytes, limit_bytes)
    else:
        bblk = max(1, min(int(batch_block), B))
    grid = (pl.cdiv(B, bblk),)   # trailing partial block rows compute garbage
                                 # that is clipped on writeback (harmless)

    kernel = _make_kernel(bblk, scale, return_alignment)

    in_specs = [
        pl.BlockSpec((bblk, T, E), lambda i: (i, 0, 0)),
        pl.BlockSpec((E, H), lambda i: (0, 0)),
        pl.BlockSpec((H, E), lambda i: (0, 0)),
    ]
    if return_alignment:
        out_shape = (jax.ShapeDtypeStruct((B, 1, E), ht.dtype),
                     jax.ShapeDtypeStruct((B, T, H), ht.dtype))
        out_specs = (pl.BlockSpec((bblk, 1, E), lambda i: (i, 0, 0)),
                     pl.BlockSpec((bblk, T, H), lambda i: (i, 0, 0)))
    else:
        out_shape = jax.ShapeDtypeStruct((B, 1, E), ht.dtype)
        out_specs = pl.BlockSpec((bblk, 1, E), lambda i: (i, 0, 0))

    outs = pl.pallas_call(
        kernel,
        out_shape=out_shape,
        grid=grid,
        in_specs=in_specs,
        out_specs=out_specs,
        compiler_params=pltpu.CompilerParams(
            dimension_semantics=("parallel",),
            vmem_limit_bytes=limit_bytes,
        ),
    )(ht, wq.astype(ht.dtype), sel.astype(jnp.float32))

    if return_alignment:
        ct3, attn = outs
        return ct3.reshape(B, E), attn
    return outs.reshape(B, E)


def _reference_forward(ht, query):
    """Pure-JAX transcription of the torch forward (for verification)."""
    B, T, E = ht.shape
    D, H = query.shape
    d_k = H  # torch: query.size(-1) on a (head_size, heads) parameter
    key = ht.reshape(B * T, H, D)
    scores = jnp.einsum('nhd,dh->nh', key, query,
                        precision=jax.lax.Precision.HIGHEST) / math.sqrt(d_k)
    scores = scores.reshape(B, T, H)
    p = jax.nn.softmax(scores, axis=1)
    value = ht.reshape(B, T, H, D)
    ct = jnp.sum(value * p[..., None], axis=1)
    return ct.reshape(B, E), p


if __name__ == "__main__":
    # Small shapes consistent with the module: encoder_size=32, heads=4.
    B, T = 2, 8
    heads_number, head_size = 4, 8
    encoder_size = heads_number * head_size

    k0, k1 = jax.random.split(jax.random.PRNGKey(0))
    ht = jax.random.normal(k0, (B, T, encoder_size), dtype=jnp.float32)

    # Deterministic xavier-normal-style init of query (head_size, heads_number).
    xavier_std = math.sqrt(2.0 / (head_size + heads_number))
    query = xavier_std * jax.random.normal(
        k1, (head_size, heads_number), dtype=jnp.float32)

    # Hoisted parameter prep (once per weight update), then the kernel call.
    wq, sel = make_pooling_params(query, heads_number, head_size)
    fwd = jax.jit(multi_head_attention_forward,
                  static_argnames=("batch_block", "return_alignment"))

    ct, attn = fwd(ht, wq, sel)
    jax.block_until_ready((ct, attn))

    ct_ref, attn_ref = _reference_forward(ht, query)
    assert ct.shape == (B, encoder_size)
    assert attn.shape == (B, T, heads_number)
    # Tolerance covers possible bf16 MXU passes under default matmul precision
    # (kernel and XLA reference may round matmul inputs differently on TPU).
    assert jnp.allclose(ct, ct_ref, atol=5e-3, rtol=5e-3)
    assert jnp.allclose(attn, attn_ref, atol=5e-3, rtol=5e-3)

    # ct-only fast path (no attention writeback).
    ct_only = fwd(ht, wq, sel, return_alignment=False)
    jax.block_until_ready(ct_only)
    assert ct_only.shape == (B, encoder_size)
    assert jnp.allclose(ct_only, ct_ref, atol=5e-3, rtol=5e-3)

    print("KERNEL_OK")
</pallas_src>

<mosaic_0001>
module attributes {stable_mosaic.version = 11 : i64} {
  func.func @kernel(%arg0: i32, %arg1: memref<1x8x32xf32, #tpu.memory_space<vmem>>, %arg2: memref<32x4xf32, #tpu.memory_space<vmem>>, %arg3: memref<4x32xf32, #tpu.memory_space<vmem>>, %arg4: memref<1x1x32xf32, #tpu.memory_space<vmem>>, %arg5: memref<1x8x4xf32, #tpu.memory_space<vmem>>) attributes {dimension_semantics = [#tpu.dimension_semantics<parallel>], iteration_bounds = array<i64: 2>, scalar_prefetch = 0 : i64, scratch_operands = 0 : i64, tpu.core_type = #tpu.core_type<tc>, window_params = [{transform_indices = @transform_0, window_bounds = array<i64: 1, 8, 32>}, {pipeline_mode = #tpu.pipeline_mode<synchronous>, transform_indices = @transform_1, window_bounds = array<i64: 32, 4>}, {pipeline_mode = #tpu.pipeline_mode<synchronous>, transform_indices = @transform_2, window_bounds = array<i64: 4, 32>}, {transform_indices = @transform_3, window_bounds = array<i64: 1, 1, 32>}, {transform_indices = @transform_4, window_bounds = array<i64: 1, 8, 4>}]} {
    %c0 = arith.constant 0 : index
    %c0_0 = arith.constant 0 : index
    %0 = vector.load %arg2[%c0, %c0_0] : memref<32x4xf32, #tpu.memory_space<vmem>>, vector<32x4xf32>
    %c0_1 = arith.constant 0 : index
    %c0_2 = arith.constant 0 : index
    %1 = vector.load %arg3[%c0_1, %c0_2] : memref<4x32xf32, #tpu.memory_space<vmem>>, vector<4x32xf32>
    %c0_i32 = arith.constant 0 : i32
    %2 = arith.index_cast %c0_i32 : i32 to index
    %c0_3 = arith.constant 0 : index
    %c0_4 = arith.constant 0 : index
    %3 = vector.load %arg1[%2, %c0_3, %c0_4] : memref<1x8x32xf32, #tpu.memory_space<vmem>>, vector<1x8x32xf32>
    %4 = vector.shape_cast %3 : vector<1x8x32xf32> to vector<8x32xf32>
    %cst = arith.constant dense<0.000000e+00> : vector<8x4xf32>
    %5 = tpu.matmul %4, %0, %cst {dimension_numbers = #tpu.dot_dimension_numbers<[1], [0], [0], [1], [0, 0, 1, 1], [], []>} : vector<8x32xf32>, vector<32x4xf32>, vector<8x4xf32> -> vector<8x4xf32>
    %cst_5 = arith.constant 5.000000e-01 : f32
    %6 = vector.broadcast %cst_5 : f32 to vector<8x4xf32>
    %7 = arith.mulf %5, %6 : vector<8x4xf32>
    %cst_6 = arith.constant dense<0xFF800000> : vector<4xf32>
    %8 = vector.multi_reduction <maximumf>, %7, %cst_6 [0] : vector<8x4xf32> to vector<4xf32>
    %9 = vector.shape_cast %8 : vector<4xf32> to vector<1x4xf32>
    %10 = vector.broadcast %9 : vector<1x4xf32> to vector<8x4xf32>
    %11 = arith.subf %7, %10 : vector<8x4xf32>
    %12 = math.exp %11 : vector<8x4xf32>
    %cst_7 = arith.constant dense<0.000000e+00> : vector<4xf32>
    %13 = vector.multi_reduction <add>, %12, %cst_7 [0] : vector<8x4xf32> to vector<4xf32>
    %14 = vector.shape_cast %13 : vector<4xf32> to vector<1x4xf32>
    %15 = tpu.reciprocal %14 {approx = true} : vector<1x4xf32> -> vector<1x4xf32>
    %16 = arith.mulf %14, %15 : vector<1x4xf32>
    %cst_8 = arith.constant 2.000000e+00 : f32
    %17 = vector.broadcast %cst_8 : f32 to vector<1x4xf32>
    %18 = arith.subf %17, %16 : vector<1x4xf32>
    %19 = arith.mulf %15, %18 : vector<1x4xf32>
    %20 = vector.broadcast %19 : vector<1x4xf32> to vector<8x4xf32>
    %21 = arith.mulf %12, %20 : vector<8x4xf32>
    %22 = arith.index_cast %c0_i32 : i32 to index
    %c0_9 = arith.constant 0 : index
    %c0_10 = arith.constant 0 : index
    %23 = vector.load %arg5[%22, %c0_9, %c0_10] : memref<1x8x4xf32, #tpu.memory_space<vmem>>, vector<1x8x4xf32>
    %24 = vector.shape_cast %23 : vector<1x8x4xf32> to vector<8x4xf32>
    %25 = vector.shape_cast %21 : vector<8x4xf32> to vector<1x8x4xf32>
    tpu.vector_store %arg5[%22, %c0_9, %c0_10], %25 {strides = array<i32>} : memref<1x8x4xf32, #tpu.memory_space<vmem>>, vector<1x8x4xf32>,
    %cst_11 = arith.constant dense<0.000000e+00> : vector<8x32xf32>
    %26 = tpu.matmul %21, %1, %cst_11 {dimension_numbers = #tpu.dot_dimension_numbers<[1], [0], [0], [1], [0, 0, 1, 1], [], []>} : vector<8x4xf32>, vector<4x32xf32>, vector<8x32xf32> -> vector<8x32xf32>
    %27 = arith.mulf %26, %4 : vector<8x32xf32>
    %cst_12 = arith.constant dense<0.000000e+00> : vector<32xf32>
    %28 = vector.multi_reduction <add>, %27, %cst_12 [0] : vector<8x32xf32> to vector<32xf32>
    %29 = vector.shape_cast %28 : vector<32xf32> to vector<1x32xf32>
    %30 = arith.index_cast %c0_i32 : i32 to index
    %c0_13 = arith.constant 0 : index
    %c0_14 = arith.constant 0 : index
    %31 = vector.load %arg4[%30, %c0_13, %c0_14] : memref<1x1x32xf32, #tpu.memory_space<vmem>>, vector<1x1x32xf32>
    %32 = vector.shape_cast %31 : vector<1x1x32xf32> to vector<1x32xf32>
    %33 = vector.shape_cast %29 : vector<1x32xf32> to vector<1x1x32xf32>
    tpu.vector_store %arg4[%30, %c0_13, %c0_14], %33 {strides = array<i32>} : memref<1x1x32xf32, #tpu.memory_space<vmem>>, vector<1x1x32xf32>,
    %c1_i32 = arith.constant 1 : i32
    return
  }
  func.func @transform_0(%arg0: i32) -> (i32, i32, i32) {
    %c0_i32 = arith.constant 0 : i32
    %c0_i32_0 = arith.constant 0 : i32
    %c0_i32_1 = arith.constant 0 : i32
    return %arg0, %c0_i32, %c0_i32_0 : i32, i32, i32
  }
  func.func @transform_1(%arg0: i32) -> (i32, i32) {
    %c0_i32 = arith.constant 0 : i32
    %c0_i32_0 = arith.constant 0 : i32
    %c0_i32_1 = arith.constant 0 : i32
    return %c0_i32, %c0_i32_0 : i32, i32
  }
  func.func @transform_2(%arg0: i32) -> (i32, i32) {
    %c0_i32 = arith.constant 0 : i32
    %c0_i32_0 = arith.constant 0 : i32
    %c0_i32_1 = arith.constant 0 : i32
    return %c0_i32, %c0_i32_0 : i32, i32
  }
  func.func @transform_3(%arg0: i32) -> (i32, i32, i32) {
    %c0_i32 = arith.constant 0 : i32
    %c0_i32_0 = arith.constant 0 : i32
    %c0_i32_1 = arith.constant 0 : i32
    return %arg0, %c0_i32, %c0_i32_0 : i32, i32, i32
  }
  func.func @transform_4(%arg0: i32) -> (i32, i32, i32) {
    %c0_i32 = arith.constant 0 : i32
    %c0_i32_0 = arith.constant 0 : i32
    %c0_i32_1 = arith.constant 0 : i32
    return %arg0, %c0_i32, %c0_i32_0 : i32, i32, i32
  }
}

</mosaic_0001>

<bundles_post_ra>
// kernel: multi_head_attention_forward.1
= control target key start
LH: loop header
LB: loop body
LE: loop exit
PB: predicated region body
PF: predicated region fallthrough
CT: control target
= control target key end

     0   :  { %10 = vsyncpa [#allocation3], 0  ;;  %s782_s0 = inlined_call_operand.vmem [shape: f32[2,8,32], index: 0, kind: input, shape index: {}]   ;;  %s783_s1 = inlined_call_operand.vmem [shape: f32[32,4], index: 1, kind: input, shape index: {}]   ;;  %s784_s2 = inlined_call_operand.vmem [shape: f32[4,32], index: 2, kind: input, shape index: {}]   ;;  %s785_s3 = inlined_call_operand.hbm [shape: f32[2,1,32], index: 3, kind: output, shape index: {0}]   ;;  %s786_s4 = inlined_call_operand.vmem [shape: f32[2,8,4], index: 4, kind: output, shape index: {1}]  }
   0x1   :  { %12 = vsyncpa [#allocation3 + $0x1], 0  ;;  %s664_s15 = smov 0   ;;  %s666_s16 = smov 0  }
   0x2   :  { %s668_s17 = smov 0   ;;  %s670_s18 = smov 0  }
   0x3 LB: > { %s685_s19 = sadd.s32 4294967295, %s634_s18   ;;  %s494_s20 = sadd.s32 4294967294, %s634_s18   ;;  %s634_s18 = sphi %s670_s18, %s792_s18   ;;  %s630_s17 = sphi %s668_s17, %s791_s17   ;;  %s626_s16 = sphi %s666_s16, %s790_s16   ;;  %s622_s15 = sphi %s664_s15, %s789_s15  }
   0x4   : > { %s689_s21 = sadd.s32 1, %s634_s18   ;;  %s93_s22 = sadd.s32 1, %s630_s17 }
   0x5   : > { %s90_s23 = ssub.s32 %s634_s18, %s689_s21  ;;  %p103_p0 = scmp.ne.s32.totalorder %s630_s17, %s626_s16 }
   0x6   : > { %p91_p1 = scmp.eq.s32.totalorder %s90_s23, 0  ;;  %p104_p2 = scmp.eq.s32.totalorder %s685_s19, 1 }
   0x7   : > { %p109_p3 = scmp.ne.s32.totalorder %s626_s16, %s622_s15  ;;  %p110_p4 = scmp.eq.s32.totalorder %s494_s20, 1 }
   0x8   : > { %s700_s24 = scalar_select %p91_p1, %s630_s17, %s93_s22  }
   0x9   : > { %p702_p5 = por %p104_p2, %p103_p0  ;;  %p706_p6 = por %p110_p4, %p109_p3 }
   0xa   : > { %p497_p7 = scmp.ge.s32.totalorder %s634_s18, 1  ;;  %p167_p8 = scmp.lt.s32.totalorder %s634_s18, 3 }
   0xc   : > { %p168_p9 = pnand %p497_p7, %p167_p8 }
   0xd   : > { %p195_p10 = scmp.lt.s32.totalorder (!%p168_p9), %s685_s19, 1  ;;  %s187_s28 = sand.u32 (!%p168_p9), 1, %s626_s16  }
   0xe   : > { %171 = sbr.rel (%p168_p9) target bundleno = 510 (0x1fe), region = 32  ;;  %s503_s29 = sshll.u32 (!%p168_p9), %s685_s19, 4 }
   0xf   : > { %s188_s30 = scalar_lea.vmem (!%p168_p9), [#allocation2], %s187_s28  ;;  %s396_s9 = scalar_lea.sflag (!%p168_p9), [#allocation3], %s187_s28 }
  0x10   : > { %s638_s11 = smov (!%p168_p9), [#allocation2]  }
  0x11   : > { %s578_s12 = sshll.u32 (!%p168_p9), %s638_s11, 4  ;;  %s579_s12 = int_to_ptr.vmem [resolvable:$false] %s578_s12 }
  0x13   : > { %v206_v0 = vld [vmem:[%s783_s1 + $0x18] sm:$0xff]  ;;  %v636_v1 = vmov 0.0   ;;  %v205_v2 = vld [vmem:[%s783_s1 + $0x10] sm:$0xff]  ;;  %vm637_vm0 = vmmov 0   ;;  %s720_s5 = scalar_select %p195_p10, %s685_s19, 1  ;;  %v204_v3 = vld [vmem:[%s783_s1 + $0x8] sm:$0xff] }
  0x14   : > { %513 = vmatprep.subr.mxu0 %v636_v1  ;;  %521 = vmatprep.mubr.msk.f32.mxu0 %vm637_vm0, %v636_v1  ;;  %v203_v4 = vld [vmem:[%s783_s1] sm:$0xff]  ;;  %vm209_vm1 = vcmask 261120   ;;  %vm311_vm2 = vcmask 1043456   ;;  %vm284_vm3 = vcmask 31744   ;;  %vm393_vm4 = vcmask 253952   ;;  %s580_s19 = scalar_lea.vmem %s579_s12, 32 }
  0x15   : > { %514 = vmatpush3.msra.mxu0 %v206_v0  ;;  %524 = vmatprep.subr.mxu1 %v636_v1  ;;  %s498_s8 = sshll.u32 %s720_s5, 3  ;;  %v207_v6 = vld [vmem:[%s784_s2] sm:$0xf]  ;;  %s412_s5 = sshll.u32 %s188_s30, 4  ;;  %s413_s5 = int_to_ptr.vmem [resolvable:$true] %s412_s5 }
  0x16   : > { %515 = vmatprep.subr.mxu0 %v636_v1  ;;  %526 = vmatprep.mubr.msk.f32.mxu1 %vm637_vm0, %v636_v1  ;;  %s198_s13 = scalar_lea.vmem %s782_s0, %s498_s8  ;;  %s202_s27 = scalar_lea.vmem %s786_s4, %s498_s8 }
  0x17   : > { %516 = vmatpush3.msra.mxu0 %v205_v2  ;;  %v208_v5 = vld [vmem:[%s198_s13] sm:$0xff]  ;;  %525 = vmatpush3.msk.msra.mxu1 %vm311_vm2, %v207_v6  ;;  %s410_s8 = scalar_lea.hbm %s785_s3, %s503_s29  ;;  %s574_s10 = scalar_lea.vmem %s413_s5, 16 }
  0x18   : > { %517 = vmatprep.subr.mxu0 %v636_v1  ;;  %p575_p11 = scmp.ne.s32.totalorder %s413_s5, %s574_s10  ;;  %p581_p0 = scmp.lt.s32.totalorder %s413_s5, %s579_s12 }
  0x19   : > { %518 = vmatpush3.msra.mxu0 %v204_v3  ;;  %p582_p1 = scmp.lt.s32.totalorder %s580_s19, %s574_s10 }
  0x1a   : > { %519 = vmatprep.subr.mxu0 %v636_v1  ;;  %p576_p12 = pnand %p575_p11, %p702_p5 }
  0x1b   : > { %520 = vmatpush3.msra.mxu0 %v203_v4  ;;  %p583_p2 = por %p582_p1, %p581_p0 }
  0x1c   : > { %522 = vmatmul.mubr.msk.f32.vlgmr.msra.gmra.mxu0 %vm209_vm1, %v208_v5  ;;  %p577_p13 = pneg %p576_p12 }
  0x1e   : > { %p584_p3 = pnand %p583_p2, %p577_p13 }
  0xdc   : > { %v279_v7 = vpop.f32.mrf.mxu0 }
  0xdd   : > { %v283_v8 = vmul.f32 0.5, %v279_v7 }
  0xde   : > { %v523_v9 = vpop.f32.mrf.mxu0 }
  0xdf   : > { %v285_v10 = vsel %vm284_vm3, %v283_v8, -inf }
  0xe0   : > { %v286_v11 = vrot.slane %v285_v10, 4 }
  0xe2   : > { %v287_v12 = vmax.f32 %v285_v10, %v286_v11 }
  0xe4   : > { %v288_v13 = vrot.slane %v287_v12, 2 }
  0xe6   : > { %v289_v14 = vmax.f32 %v287_v12, %v288_v13 }
  0xe8   : > { %v290_v15 = vrot.slane %v289_v14, 1 }
  0xea   : > { %v291_v16 = vmax.f32 %v289_v14, %v290_v15 }
  0xec   : > { %v292_v17 = vsub.f32 %v283_v8, %v291_v16 }
  0xee   : > { %v293_v18 = vmul.f32 1.442695, %v292_v17 }
  0xf0   : > { %570 = vpow2.f32 %v293_v18 }
  0xfd   : > { %v571_v19 = vpop.eup %570 }
  0xfe   : > { %v295_v20 = vsel %vm284_vm3, %v571_v19, 0.0 }
  0xff   : > { %v296_v21 = vrot.slane %v295_v20, 4 }
 0x101   : > { %v297_v22 = vadd.f32 %v296_v21, %v295_v20 }
 0x103   : > { %v298_v23 = vrot.slane %v297_v22, 2 }
 0x105   : > { %v299_v24 = vadd.f32 %v298_v23, %v297_v22 }
 0x107   : > { %v300_v25 = vrot.slane %v299_v24, 1 }
 0x109   : > { %v301_v26 = vadd.f32 %v300_v25, %v299_v24 }
 0x10b   : > { %572 = vrcp.f32 %v301_v26 }
 0x118   : > { %v573_v27 = vpop.eup %572 }
 0x119   : > { %v303_v28 = vmul.f32 %v573_v27, %v301_v26 }
 0x11b   : > { %v304_v29 = vsub.f32 2.0, %v303_v28 }
 0x11d   : > { %v305_v30 = vmul.f32 %v573_v27, %v304_v29 }
 0x11f   : > { %v306_v31 = vmul.f32 %v571_v19, %v305_v30 }
 0x121   : > { %307 = vst.msk [vmem:[%s202_s27] sm:$0xff] %vm284_vm3, %v306_v31  ;;  %527 = vmatmul.mubr.msk.f32.vlgmr.msra.gmra.mxu1 %vm284_vm3, %v306_v31 }
 0x1e1   : > { %v381_v32 = vpop.f32.mrf.mxu1 }
 0x1e2   : > { %v385_v33 = vmul.f32 %v381_v32, %v208_v5 }
 0x1e3   : > { %v528_v34 = vpop.f32.mrf.mxu1 }
 0x1e4   : > { %v386_v35 = vsel %vm209_vm1, %v385_v33, 0.0 }
 0x1e5   : > { %v387_v36 = vrot.slane %v386_v35, 4 }
 0x1e7   : > { %v388_v37 = vadd.f32 %v387_v36, %v386_v35 }
 0x1e9   : > { %v389_v38 = vrot.slane %v388_v37, 2 }
 0x1eb   : > { %v390_v39 = vadd.f32 %v389_v38, %v388_v37 }
 0x1ed   : > { %v391_v40 = vrot.slane %v390_v39, 1 }
 0x1ef   : > { %v392_v41 = vadd.f32 %v391_v40, %v390_v39 }
 0x1f1   : > { %394 = vst.msk [vmem:[%s188_s30] sm:$0x1] %vm393_vm4, %v392_v41 }
 0x1f2   : > { %587 = shalt.err (!%p584_p3)
}
 0x1f3   : > { %s588_s13 = scalar_lea.hbm %s410_s8, 16  ;;  %s592_s22 = scalar_lea.hbm %s785_s3, 32 }
 0x1f4   : > { %p589_p4 = scmp.ne.s32.totalorder %s410_s8, %s588_s13  ;;  %p593_p9 = scmp.lt.s32.totalorder %s410_s8, %s785_s3 }
 0x1f5   : > { %p594_p10 = scmp.lt.s32.totalorder %s592_s22, %s588_s13 }
 0x1f6   : > { %p590_p7 = pnand %p589_p4, %p702_p5 }
 0x1f7   : > { %p595_p11 = por %p594_p10, %p593_p9 }
 0x1f8   : > { %p591_p8 = pneg %p590_p7 }
 0x1fa   : > { %p596_p12 = pnand %p595_p11, %p591_p8 }
 0x1fc   : > { %599 = shalt.err (!%p596_p12)
}
 0x1fd   : > { %529 = dma.vmem_to_hbm [thread:$0]  (%p702_p5), %s413_s5, 16, %s410_s8, %s396_s9  }
 0x1fe PF: > { %p535_p13 = scmp.ge.s32.totalorder %s634_s18, 2  ;;  %s427_s28 = sand.u32 1, %s622_s15  }
 0x1ff   : > { %s428_s29 = scalar_lea.sflag [#allocation3], %s427_s28 }
 0x200   : > { %p532_p0 = pnand %p535_p13, %p706_p6 }
 0x202   : > { %p533_p1 = pneg %p532_p0 }
 0x204   : > { %617 = dma.done.wait (%p533_p1), %s428_s29, 16  }
 0x205   : > { %619 = vsyncadd (%p533_p1), %s428_s29, 4294967280  ;;  %p15_p2 = scmp.ge.s32.totalorder %s689_s21, 4   ;;  %s789_s15 = smov %s626_s16 }
 0x206   : > { %s790_s16 = smov %s630_s17  ;;  %s791_s17 = smov %s700_s24 }
 0x207   : > { %s792_s18 = smov %s689_s21  ;;  %17 = sbr.rel (!%p15_p2) target bundleno = 3 (0x3), region = 79 }
 0x20c   :  { %439 = vsyncpa [#allocation3], 1 }
 0x20d   :  { %441 = vsyncpa [#allocation3 + $0x1], 1 }

</bundles_post_ra>
